<compile_context>
chip_gen: v7x
topology: tpu7x:2x2x1
jax: 0.10.0
libtpu: 0.0.40
codegen_flags: <defaults>
</compile_context>

<pallas_src>
import jax
import jax.numpy as jnp
from jax.experimental import pallas as pl
from jax.experimental.pallas import tpu as pltpu


# -----------------------------------------------------------------------------
# Tiling / resource policy
# -----------------------------------------------------------------------------
# One bf16 weight tile streamed per grid step; Pallas double-buffers it, so
# steady-state VMEM is ~2x this plus small x / bias / accumulator buffers.
_W_TILE_BUDGET_BYTES = 12 * 1024 * 1024
# Explicit scoped-VMEM request: above the 16/32 MiB defaults, below physical
# capacity on every generation (v5e/v6e 128 MiB, v7x 64 MiB).
_VMEM_LIMIT_BYTES = 48 * 1024 * 1024


def _pick_col_tile(num_cols):
    """Lane-dense (multiple-of-128) column tile that divides the class count."""
    for tn in (512, 256, 128):
        if num_cols % tn == 0:
            return tn
    return num_cols  # ragged K: single (lane-padded) column block


def _pick_d_tile(d, n_cols, itemsize=2):
    """Largest multiple-of-256 D tile whose bf16 weight tile fits the budget and divides D."""
    max_tk = max(256, (_W_TILE_BUDGET_BYTES // (n_cols * itemsize)) // 256 * 256)
    tk = min(d, max_tk) // 256 * 256
    while tk >= 256:
        if d % tk == 0:
            return tk
        tk -= 256
    return d  # D not a multiple of 256: fall back to a single (un-tiled) block


# -----------------------------------------------------------------------------
# Kernels
# -----------------------------------------------------------------------------
def _folded_kernel(x_ref, w_ref, b_ref, o_ref, acc_ref):
    """'average'/'weighted' with pre-folded W_eff: one (B,tk)@(tk,tn) MXU step.

    Grid = (K//tn, D//tk): axis 0 is parallel over output columns (megacore on
    v7x), axis 1 is the sequential D reduction with an f32 VMEM accumulator.
    """
    k = pl.program_id(1)

    @pl.when(k == 0)
    def _():
        acc_ref[...] = jnp.zeros_like(acc_ref)

    acc_ref[...] += jnp.dot(x_ref[...], w_ref[...],
                            preferred_element_type=jnp.float32)

    @pl.when(k == pl.num_programs(1) - 1)
    def _():
        o_ref[...] = (acc_ref[...] + b_ref[...]).astype(o_ref.dtype)


def _max_kernel(x_ref, w_ref, b_ref, o_ref, acc_ref, run_ref):
    """'max' voting. Grid = (M, D//tk), member axis outer, D reduction inner.

    For each member we accumulate the full (B,K) logits over D in f32 scratch,
    then fold them into a running element-wise max; the (B,K) output is written
    once on the final grid step.
    """
    m = pl.program_id(0)
    k = pl.program_id(1)

    @pl.when(k == 0)
    def _():
        acc_ref[...] = jnp.zeros_like(acc_ref)

    acc_ref[...] += jnp.dot(x_ref[...], w_ref[...],
                            preferred_element_type=jnp.float32)

    @pl.when(k == pl.num_programs(1) - 1)
    def _():
        logits_m = acc_ref[...] + b_ref[pl.ds(m, 1), :]      # (B,K) + (1,K)

        @pl.when(m == 0)
        def _():
            run_ref[...] = logits_m

        @pl.when(m > 0)
        def _():
            run_ref[...] = jnp.maximum(run_ref[...], logits_m)

        @pl.when(m == pl.num_programs(0) - 1)
        def _():
            o_ref[...] = run_ref[...].astype(o_ref.dtype)


# -----------------------------------------------------------------------------
# Init-time preparation (mirrors EnsembleModel.__init__) — run ONCE, not per call
# -----------------------------------------------------------------------------
def prepare_ensemble_params(stacked_w, stacked_b, ens_weights=None,
                            voting_method="average"):
    """Fold / cast the member weights once so no weight-sized work runs per forward.

    stacked_w: (M, D, K) f32, stacked_b: (M, K) f32, ens_weights: (M,) or None.
    """
    M, _, K = stacked_w.shape
    if ens_weights is None:
        ens_weights = jnp.full((M,), 1.0 / M, dtype=jnp.float32)
    ens_weights = jnp.asarray(ens_weights, dtype=jnp.float32)
    if voting_method == "average":
        # PyTorch 'average' is an unweighted mean regardless of self.weights.
        ens_weights = jnp.full((M,), 1.0 / M, dtype=jnp.float32)

    if voting_method in ("average", "weighted"):
        w_eff = jnp.einsum("m,mdk->dk", ens_weights, stacked_w.astype(jnp.float32))
        b_eff = jnp.einsum("m,mk->k", ens_weights, stacked_b.astype(jnp.float32))
        return {
            "mode": "folded",
            "w": w_eff.astype(jnp.bfloat16),                 # (D, K)
            "b": b_eff.reshape(1, K).astype(jnp.float32),    # (1, K)
        }
    if voting_method == "max":
        return {
            "mode": "max",
            "w": stacked_w.astype(jnp.bfloat16),             # (M, D, K) streamed per member
            "b": stacked_b.astype(jnp.float32),              # (M, K) resident in VMEM
        }
    raise ValueError(f"Unknown voting method: {voting_method}")


# -----------------------------------------------------------------------------
# Forward pass
# -----------------------------------------------------------------------------
def ensemble_forward(x_nchw, params, *, tk=None, tn=None):
    """Ensemble forward. `params` comes from prepare_ensemble_params (init-time)."""
    B = x_nchw.shape[0]
    # NCHW -> (B, D); the per-call bf16 cast only touches x, which is tiny vs. W.
    x_flat = x_nchw.reshape(B, -1).astype(jnp.bfloat16)
    D = x_flat.shape[1]

    if params["mode"] == "folded":
        w, b = params["w"], params["b"]                      # (D,K) bf16, (1,K) f32
        assert w.shape[0] == D
        K = w.shape[1]
        tn = tn if tn is not None else _pick_col_tile(K)
        tk = tk if tk is not None else _pick_d_tile(D, tn)
        assert K % tn == 0 and D % tk == 0

        grid_spec = pltpu.PrefetchScalarGridSpec(
            num_scalar_prefetch=0,
            grid=(K // tn, D // tk),
            in_specs=[
                pl.BlockSpec((B, tk), lambda j, k: (0, k)),    # x strip
                pl.BlockSpec((tk, tn), lambda j, k: (k, j)),   # W_eff tile
                pl.BlockSpec((1, tn), lambda j, k: (0, j)),    # b_eff tile
            ],
            out_specs=pl.BlockSpec((B, tn), lambda j, k: (0, j)),
            scratch_shapes=[pltpu.VMEM((B, tn), jnp.float32)],
        )
        flops = 2 * B * D * K
        bytes_accessed = (B * D * 2) * (K // tn) + D * K * 2 + K * 4 + B * K * 4
        return pl.pallas_call(
            _folded_kernel,
            out_shape=jax.ShapeDtypeStruct((B, K), jnp.float32),
            grid_spec=grid_spec,
            compiler_params=pltpu.CompilerParams(
                dimension_semantics=("parallel", "arbitrary"),
                vmem_limit_bytes=_VMEM_LIMIT_BYTES,
            ),
            cost_estimate=pl.CostEstimate(
                flops=flops, transcendentals=0, bytes_accessed=bytes_accessed),
        )(x_flat, w, b)

    if params["mode"] == "max":
        w, b = params["w"], params["b"]                      # (M,D,K) bf16, (M,K) f32
        M, d_w, K = w.shape
        assert d_w == D
        tk = tk if tk is not None else _pick_d_tile(D, K)
        assert D % tk == 0

        grid_spec = pltpu.PrefetchScalarGridSpec(
            num_scalar_prefetch=0,
            grid=(M, D // tk),
            in_specs=[
                pl.BlockSpec((B, tk), lambda m, k: (0, k)),                     # x strip
                pl.BlockSpec((pl.Squeezed(), tk, K), lambda m, k: (m, k, 0)),   # W_m tile
                pl.BlockSpec((M, K), lambda m, k: (0, 0)),                      # all biases
            ],
            out_specs=pl.BlockSpec((B, K), lambda m, k: (0, 0)),
            scratch_shapes=[pltpu.VMEM((B, K), jnp.float32),   # D-reduction accumulator
                            pltpu.VMEM((B, K), jnp.float32)],  # running max
        )
        flops = 2 * B * D * M * K
        bytes_accessed = M * B * D * 2 + M * D * K * 2 + M * K * 4 + B * K * 4
        return pl.pallas_call(
            _max_kernel,
            out_shape=jax.ShapeDtypeStruct((B, K), jnp.float32),
            grid_spec=grid_spec,
            compiler_params=pltpu.CompilerParams(
                dimension_semantics=("arbitrary", "arbitrary"),
                vmem_limit_bytes=_VMEM_LIMIT_BYTES,
            ),
            cost_estimate=pl.CostEstimate(
                flops=flops, transcendentals=0, bytes_accessed=bytes_accessed),
        )(x_flat, w, b)

    raise ValueError(f"Unknown prepared mode: {params['mode']}")


# -----------------------------------------------------------------------------
# Pure-JAX f32 reference mirroring PyTorch EnsembleModel.forward
# -----------------------------------------------------------------------------
def ensemble_reference(x_nchw, stacked_w, stacked_b, ens_weights, voting_method):
    M = stacked_w.shape[0]
    B = x_nchw.shape[0]
    x_flat = x_nchw.reshape(B, -1).astype(jnp.float32)
    outs = jnp.einsum("bd,mdk->mbk", x_flat, stacked_w.astype(jnp.float32))
    outs = outs + stacked_b.astype(jnp.float32)[:, None, :]
    if voting_method == "average":
        return outs.mean(axis=0)
    if voting_method == "weighted":
        w = (jnp.asarray(ens_weights, jnp.float32) if ens_weights is not None
             else jnp.full((M,), 1.0 / M, jnp.float32))
        return (w[:, None, None] * outs).sum(axis=0)
    if voting_method == "max":
        return outs.max(axis=0)
    raise ValueError(voting_method)


if __name__ == "__main__":
    # Small deterministic setup: 3 member models, NCHW input (2, 4, 16, 16),
    # K = 128 output classes (lane-aligned).
    M = 3
    B, C, H, W = 2, 4, 16, 16
    D = C * H * W
    K = 128

    key = jax.random.PRNGKey(0)
    kx, kw, kb = jax.random.split(key, 3)
    x = jax.random.normal(kx, (B, C, H, W), dtype=jnp.float32)
    stacked_w = jax.random.normal(kw, (M, D, K), dtype=jnp.float32) * 0.02
    stacked_b = jax.random.normal(kb, (M, K), dtype=jnp.float32) * 0.1

    cases = [
        ("average", None),
        ("weighted", jnp.array([0.5, 0.3, 0.2], dtype=jnp.float32)),
        ("max", None),
    ]

    ok = True
    for method, weights in cases:
        # Init-time (once per model): fold/cast weights — not on the per-call path.
        params = prepare_ensemble_params(stacked_w, stacked_b, weights, method)
        # tk=256 forces a 4-step D reduction so the accumulator path is exercised.
        out = ensemble_forward(x, params, tk=256)
        out = jax.block_until_ready(out)
        ref = ensemble_reference(x, stacked_w, stacked_b, weights, method)
        # bf16 streaming of x/W vs. f32 reference -> widened tolerance (f32 MXU acc).
        if out.shape != ref.shape or not jnp.allclose(out, ref, atol=3e-2, rtol=3e-2):
            ok = False

    # TODO(synk): extract_features() (per-member feature extractors + F.normalize)
    # is not part of forward() and is not implemented here.

    if ok:
        print("KERNEL_OK")
</pallas_src>

<mosaic_0001>
module attributes {stable_mosaic.version = 11 : i64} {
  func.func @_folded_kernel(%arg0: i32, %arg1: i32, %arg2: memref<2x256xbf16, #tpu.memory_space<vmem>>, %arg3: memref<256x128xbf16, #tpu.memory_space<vmem>>, %arg4: memref<1x128xf32, #tpu.memory_space<vmem>>, %arg5: memref<2x128xf32, #tpu.memory_space<vmem>>, %arg6: memref<2x128xf32, #tpu.memory_space<vmem>>) attributes {dimension_semantics = [#tpu.dimension_semantics<parallel>, #tpu.dimension_semantics<arbitrary>], iteration_bounds = array<i64: 1, 4>, scalar_prefetch = 0 : i64, scratch_operands = 1 : i64, tpu.core_type = #tpu.core_type<tc>, window_params = [{transform_indices = @transform_0, window_bounds = array<i64: 2, 256>}, {transform_indices = @transform_1, window_bounds = array<i64: 256, 128>}, {transform_indices = @transform_2, window_bounds = array<i64: 1, 128>}, {transform_indices = @transform_3, window_bounds = array<i64: 2, 128>}]} {
    %c0_i32 = arith.constant 0 : i32
    %0 = arith.cmpi eq, %arg1, %c0_i32 : i32
    %1 = arith.extui %0 : i1 to i32
    %c0_i32_0 = arith.constant 0 : i32
    %2 = arith.cmpi ne, %1, %c0_i32_0 : i32
    scf.if %2 {
      %cst_9 = arith.constant 0.000000e+00 : f32
      %12 = vector.broadcast %cst_9 : f32 to vector<2x128xf32>
      %c0_10 = arith.constant 0 : index
      %c0_11 = arith.constant 0 : index
      %13 = vector.load %arg6[%c0_10, %c0_11] : memref<2x128xf32, #tpu.memory_space<vmem>>, vector<2x128xf32>
      tpu.vector_store %arg6[%c0_10, %c0_11], %12 {strides = array<i32>} : memref<2x128xf32, #tpu.memory_space<vmem>>, vector<2x128xf32>,
    } else {
    }
    %c0 = arith.constant 0 : index
    %c0_1 = arith.constant 0 : index
    %3 = vector.load %arg6[%c0, %c0_1] : memref<2x128xf32, #tpu.memory_space<vmem>>, vector<2x128xf32>
    %c0_2 = arith.constant 0 : index
    %c0_3 = arith.constant 0 : index
    %4 = vector.load %arg2[%c0_2, %c0_3] : memref<2x256xbf16, #tpu.memory_space<vmem>>, vector<2x256xbf16>
    %c0_4 = arith.constant 0 : index
    %c0_5 = arith.constant 0 : index
    %5 = vector.load %arg3[%c0_4, %c0_5] : memref<256x128xbf16, #tpu.memory_space<vmem>>, vector<256x128xbf16>
    %cst = arith.constant dense<0.000000e+00> : vector<2x128xf32>
    %6 = tpu.matmul %4, %5, %cst {dimension_numbers = #tpu.dot_dimension_numbers<[1], [0], [0], [1], [0, 0, 1, 1], [], []>} : vector<2x256xbf16>, vector<256x128xbf16>, vector<2x128xf32> -> vector<2x128xf32>
    %7 = arith.addf %3, %6 : vector<2x128xf32>
    %c0_6 = arith.constant 0 : index
    %c0_7 = arith.constant 0 : index
    %8 = vector.load %arg6[%c0_6, %c0_7] : memref<2x128xf32, #tpu.memory_space<vmem>>, vector<2x128xf32>
    tpu.vector_store %arg6[%c0_6, %c0_7], %7 {strides = array<i32>} : memref<2x128xf32, #tpu.memory_space<vmem>>, vector<2x128xf32>,
    %c3_i32 = arith.constant 3 : i32
    %9 = arith.cmpi eq, %arg1, %c3_i32 : i32
    %10 = arith.extui %9 : i1 to i32
    %c0_i32_8 = arith.constant 0 : i32
    %11 = arith.cmpi ne, %10, %c0_i32_8 : i32
    scf.if %11 {
      %c0_9 = arith.constant 0 : index
      %c0_10 = arith.constant 0 : index
      %12 = vector.load %arg6[%c0_9, %c0_10] : memref<2x128xf32, #tpu.memory_space<vmem>>, vector<2x128xf32>
      %c0_11 = arith.constant 0 : index
      %c0_12 = arith.constant 0 : index
      %13 = vector.load %arg4[%c0_11, %c0_12] : memref<1x128xf32, #tpu.memory_space<vmem>>, vector<1x128xf32>
      %14 = vector.broadcast %13 : vector<1x128xf32> to vector<2x128xf32>
      %15 = arith.addf %12, %14 : vector<2x128xf32>
      %c0_13 = arith.constant 0 : index
      %c0_14 = arith.constant 0 : index
      %16 = vector.load %arg5[%c0_13, %c0_14] : memref<2x128xf32, #tpu.memory_space<vmem>>, vector<2x128xf32>
      tpu.vector_store %arg5[%c0_13, %c0_14], %15 {strides = array<i32>} : memref<2x128xf32, #tpu.memory_space<vmem>>, vector<2x128xf32>,
    } else {
    }
    return
  }
  func.func @transform_0(%arg0: i32, %arg1: i32) -> (i32, i32) {
    %c0_i32 = arith.constant 0 : i32
    %c0_i32_0 = arith.constant 0 : i32
    return %c0_i32, %arg1 : i32, i32
  }
  func.func @transform_1(%arg0: i32, %arg1: i32) -> (i32, i32) {
    %c0_i32 = arith.constant 0 : i32
    return %arg1, %arg0 : i32, i32
  }
  func.func @transform_2(%arg0: i32, %arg1: i32) -> (i32, i32) {
    %c0_i32 = arith.constant 0 : i32
    %c0_i32_0 = arith.constant 0 : i32
    return %c0_i32, %arg0 : i32, i32
  }
  func.func @transform_3(%arg0: i32, %arg1: i32) -> (i32, i32) {
    %c0_i32 = arith.constant 0 : i32
    %c0_i32_0 = arith.constant 0 : i32
    return %c0_i32, %arg0 : i32, i32
  }
}

</mosaic_0001>

<bundles_post_ra>
// kernel: tpu_custom_call.1
= control target key start
LH: loop header
LB: loop body
LE: loop exit
PB: predicated region body
PF: predicated region fallthrough
CT: control target
= control target key end

     0   :  { %8 = vsyncpa [#allocation4], 0  ;;  %s1121_s0 = inlined_call_operand.hbm [shape: bf16[2,1024], index: 0, kind: input, shape index: {}]   ;;  %s1122_s1 = inlined_call_operand.hbm [shape: bf16[1024,128], index: 1, kind: input, shape index: {}]   ;;  %s1123_s2 = inlined_call_operand.vmem [shape: f32[1,128], index: 2, kind: input, shape index: {}]   ;;  %s1124_s3 = inlined_call_operand.hbm [shape: f32[2,128], index: 3, kind: output, shape index: {}]  }
   0x1   :  { %10 = vsyncpa [#allocation4 + $0x1], 0 }
   0x2   :  { %11 = vsyncpa [#allocation7], 0 }
   0x3   :  { %13 = vsyncpa [#allocation7 + $0x1], 0 }
   0x4   :  { %14 = vsyncpa [#allocation5], 0  ;;  %s896_s12 = smov 0   ;;  %s898_s13 = smov 0  }
   0x5   :  { %s900_s14 = smov 0   ;;  %s902_s15 = smov 0  }
   0x6   :  { %s904_s16 = smov 0   ;;  %s906_s17 = smov 0  }
   0x7 LB: > { %s575_s18 = sadd.s32 4294967295, %s867_s17   ;;  %s29_s19 = sadd.s32 1, %s863_s16  ;;  %s867_s17 = sphi %s906_s17, %s20_s17   ;;  %s863_s16 = sphi %s904_s16, %s1138_s16   ;;  %s859_s15 = sphi %s902_s15, %s1137_s15   ;;  %s855_s14 = sphi %s900_s14, %s1136_s14   ;;  %s851_s13 = sphi %s898_s13, %s1135_s13   ;;  %s847_s12 = sphi %s896_s12, %s1134_s12  }
   0x8   : > { %p30_p0 = scmp.ge.s32.totalorder %s29_s19, 4  ;;  %s39_s20 = sadd.s32 1, %s855_s14 }
   0x9   : > { %p46_p1 = scmp.ne.s32.totalorder %s855_s14, %s851_s13  ;;  %p47_p2 = scmp.eq.s32.totalorder %s867_s17, 0 }
   0xa   : > { %s1140_s19 = smov (%p30_p0, %s29_s19), 0  ;;  %p52_p4 = scmp.ne.s32.totalorder %s851_s13, %s847_s12 }
   0xb   : > { %p932_p3 = por %p47_p2, %p46_p1  ;;  %s36_s22 = ssub.s32 %s863_s16, %s1140_s19 }
   0xc   : > { %p53_p5 = scmp.eq.s32.totalorder %s575_s18, 0  ;;  %p37_p6 = scmp.eq.s32.totalorder %s36_s22, 0 }
   0xd   : > { %p651_p8 = scmp.lt.s32.totalorder %s867_s17, 4  ;;  %s950_s25 = sand.u32 1, %s855_s14  }
   0xe   : > { %p941_p7 = por %p53_p5, %p52_p4  ;;  %s612_s26 = sshll.u32 %s863_s16, 5 }
   0xf   : > { %s947_s24 = scalar_select %p37_p6, %s855_s14, %s39_s20  }
  0x10   : > { %s1127_s23 = scalar_select %p941_p7, 1, 0 }
  0x11   : > { %s579_s27 = sshll.u32 %s950_s25, 1  ;;  %s957_s30 = scalar_lea.hbm %s1121_s0, %s612_s26 }
  0x12   : > { %s166_s4 = scalar_lea.vmem [#allocation3], %s579_s27  ;;  %p961_p9 = pnand %p651_p8, %p932_p3 }
  0x13   : > { %s174_s5 = sshll.u32 %s166_s4, 4  ;;  %s163_s7 = scalar_lea.sflag [#allocation4], %s950_s25  ;;  %s965_s5 = int_to_ptr.vmem [resolvable:$true] %s174_s5 }
  0x14   : > { %s723_s8 = scalar_lea.hbm %s957_s30, 32  ;;  %p725_p13 = pneg %p961_p9 }
  0x15   : > { %p724_p12 = scmp.ne.s32.totalorder %s957_s30, %s723_s8  ;;  %s728_s11 = scalar_lea.hbm %s1121_s0, 128 }
  0x16   : > { %p729_p2 = scmp.lt.u32.totalorder %s957_s30, %s1121_s0  ;;  %p730_p3 = scmp.lt.u32.totalorder %s728_s11, %s723_s8 }
  0x17   : > { %p726_p0 = pnand %p725_p13, %p724_p12  ;;  %p732_p5 = scmp.lt.u32.totalorder %s723_s8, %s957_s30 }
  0x18   : > { %p731_p4 = por %p730_p3, %p729_p2 }
  0x19   : > { %p727_p1 = pneg %p726_p0 }
  0x1a   : > { %p733_p6 = por %p732_p5, %p731_p4 }
  0x1c   : > { %p734_p8 = pnand %p733_p6, %p727_p1 }
  0x1e   : > { %737 = shalt.err (!%p734_p8)
}
  0x1f   : > { %s738_s21 = scalar_lea.vmem %s965_s5, 32  ;;  %s869_s22 = smov [#allocation3]  }
  0x20   : > { %p739_p12 = scmp.ne.s32.totalorder %s965_s5, %s738_s21  ;;  %s743_s26 = sshll.u32 %s869_s22, 4  ;;  %s744_s26 = int_to_ptr.vmem [resolvable:$false] %s743_s26 }
  0x21   : > { %s745_s27 = scalar_lea.vmem %s744_s26, 64  ;;  %p746_p11 = scmp.lt.s32.totalorder %s965_s5, %s744_s26 }
  0x22   : > { %p741_p0 = pnand %p739_p12, %p725_p13  ;;  %p747_p2 = scmp.lt.s32.totalorder %s745_s27, %s738_s21 }
  0x24   : > { %p742_p10 = pneg %p741_p0  ;;  %p748_p3 = por %p747_p2, %p746_p11 }
  0x26   : > { %p749_p4 = pnand %p748_p3, %p742_p10 }
  0x28   : > { %752 = shalt.err (!%p749_p4)
}
  0x29   : > { %647 = dma.hbm_to_vmem [thread:$0]  (!%p961_p9), %s957_s30, 32, %s965_s5, %s163_s7  }
  0x2a   : > { %p1129_p1 = scmp.lt.s32.totalorder %s867_s17, 5  ;;  %p1130_p5 = scmp.ge.s32.totalorder %s867_s17, 1 }
  0x2b   : > { %s582_s29 = sshll.u32 %s950_s25, 7  ;;  %s613_s4 = sshll.u32 %s863_s16, 11 }
  0x2c   : > { %p999_p6 = pnand %p1130_p5, %p1129_p1  ;;  %s1008_s10 = scalar_lea.hbm %s1122_s1, %s613_s4 }
  0x2d   : > { %s185_s11 = scalar_lea.vmem [#allocation6], %s582_s29  ;;  %s182_s30 = scalar_lea.sflag [#allocation7], %s950_s25 }
  0x2e   : > { %s193_s12 = sshll.u32 %s185_s11, 4  ;;  %s753_s5 = scalar_lea.hbm %s1008_s10, 2048  ;;  %s1010_s12 = int_to_ptr.vmem [resolvable:$true] %s193_s12 }
  0x2f   : > { %p754_p10 = scmp.ne.s32.totalorder %s1008_s10, %s753_s5  ;;  %s758_s21 = scalar_lea.hbm %s1122_s1, 8192 }
  0x30   : > { %p759_p12 = scmp.lt.u32.totalorder %s1008_s10, %s1122_s1  ;;  %p760_p0 = scmp.lt.u32.totalorder %s758_s21, %s753_s5 }
  0x31   : > { %p756_p11 = pnand %p754_p10, %p725_p13  ;;  %p762_p3 = scmp.lt.u32.totalorder %s753_s5, %s1008_s10 }
  0x32   : > { %p761_p2 = por %p760_p0, %p759_p12 }
  0x33   : > { %p757_p8 = pneg %p756_p11 }
  0x34   : > { %p763_p4 = por %p762_p3, %p761_p2 }
  0x36   : > { %p764_p1 = pnand %p763_p4, %p757_p8 }
  0x38   : > { %767 = shalt.err (!%p764_p1)
}
  0x39   : > { %s768_s27 = scalar_lea.vmem %s1010_s12, 2048  ;;  %s870_s29 = smov [#allocation6]  }
  0x3a   : > { %p769_p5 = scmp.ne.s32.totalorder %s1010_s12, %s768_s27  ;;  %s773_s4 = sshll.u32 %s870_s29, 4  ;;  %s774_s4 = int_to_ptr.vmem [resolvable:$false] %s773_s4 }
  0x3b   : > { %s775_s8 = scalar_lea.vmem %s774_s4, 4096  ;;  %p776_p7 = scmp.lt.s32.totalorder %s1010_s12, %s774_s4 }
  0x3c   : > { %p771_p10 = pnand %p769_p5, %p725_p13  ;;  %p777_p12 = scmp.lt.s32.totalorder %s775_s8, %s768_s27 }
  0x3e   : > { %p772_p11 = pneg %p771_p10  ;;  %p778_p0 = por %p777_p12, %p776_p7 }
  0x40   : > { %p779_p2 = pnand %p778_p0, %p772_p11 }
  0x42   : > { %782 = shalt.err (!%p779_p2)
}
  0x43   : > { %s871_s9 = smov 64   ;;  %s872_s11 = smov 4  }
  0x44   : > { %650 = dma.hbm_to_vmem [thread:$0]  (!%p961_p9), %s1008_s10, 2048, %s1010_s12, %s182_s30, %s871_s9, %s871_s9, %s872_s11  }
  0x45   : > { %205 = sbr.rel (%p999_p6) target bundleno = 375 (0x177), region = 32  ;;  %s207_s5 = sand.u32 (!%p999_p6), 1, %s851_s13  }
  0x46   : > { %s586_s7 = sshll.u32 (!%p999_p6), %s207_s5, 1  ;;  %s208_s20 = scalar_lea.sflag (!%p999_p6), [#allocation4], %s207_s5 }
  0x47   : > { %s1041_s21 = scalar_lea.vmem (!%p999_p6), [#allocation3], %s586_s7  ;;  %p1132_p7 = scmp.ne.s32.totalorder (!%p999_p6), %s1127_s23, 0 }
  0x4c   : > { %834 = dma.done.wait (%p1132_p7), %s208_s20, 32  }
  0x4d   : > { %836 = vsyncadd (%p1132_p7), %s208_s20, 4294967264  ;;  %s587_s22 = sshll.u32 %s207_s5, 7  ;;  %s217_s6 = scalar_lea.sflag [#allocation7], %s207_s5 }
  0x4e   : > { %s1047_s25 = scalar_lea.vmem [#allocation6], %s587_s22 }
  0x4f   : > { %838 = dma.done.wait (%p1132_p7), %s217_s6, 2048  }
  0x50   : > { %840 = vsyncadd (%p1132_p7), %s217_s6, 4294965248  ;;  %p588_p9 = scmp.ne.s32.totalorder %s859_s15, 0 }
  0x51   : > { %v873_v0 = vmov (!%p588_p9), 0.0  }
  0x52   : > { %255 = sbr.rel (%p588_p9) target bundleno = 89 (0x59), region = 44  ;;  %256 = vst [vmem:[#allocation2] sm:$0x3] (!%p588_p9), %v873_v0 }
  0x59 PF: > { %v707_v1 = vld [vmem:[%s1047_s25 + $0x40] sm:$0xff]   ;;  %v709_v3 = vld [vmem:[%s1047_s25 + $0x48] sm:$0xff]   ;;  %v711_v5 = vld [vmem:[%s1047_s25 + $0x50] sm:$0xff]   ;;  %v303_v10 = vlaneseq  ;;  %v874_v14 = vmov 1966171168   ;;  %p606_p13 = scmp.ne.s32.totalorder %s859_s15, 3 }
  0x5a   : > { %v708_v2 = vld [vmem:[%s1047_s25] sm:$0xff]   ;;  %614 = vmatprep.subr.bf16.mxu0 %v707_v1  ;;  %v710_v4 = vld [vmem:[%s1047_s25 + $0x8] sm:$0xff]   ;;  %v712_v6 = vld [vmem:[%s1047_s25 + $0x10] sm:$0xff]   ;;  %v301_v15 = vunpack.c.l.s4 %v874_v14 }
  0x5b   : > { %615 = vmatpush3.bf16.msra.mxu0 %v708_v2  ;;  %v713_v7 = vld [vmem:[%s1047_s25 + $0x58] sm:$0xff]   ;;  %v715_v9 = vld [vmem:[%s1047_s25 + $0x60] sm:$0xff]   ;;  %v717_v12 = vld [vmem:[%s1047_s25 + $0x68] sm:$0xff]   ;;  %v304_v16 = vshrl.u32 %v303_v10, 7 }
  0x5c   : > { %616 = vmatprep.subr.bf16.mxu0 %v709_v3  ;;  %v714_v8 = vld [vmem:[%s1047_s25 + $0x18] sm:$0xff]   ;;  %v716_v11 = vld [vmem:[%s1047_s25 + $0x20] sm:$0xff]   ;;  %v718_v17 = vld [vmem:[%s1047_s25 + $0x28] sm:$0xff]   ;;  %v302_v19 = vunpack.c.0.s8 %v301_v15 }
  0x5d   : > { %v589_v13 = vld.sshfl [vmem:[%s1041_s21] sm:$0x11 pattern:$0x75316420]  ;;  %v719_v20 = vld [vmem:[%s1047_s25 + $0x70] sm:$0xff]  }
  0x5e   : > { %v299_v18 = vcombine.high %v589_v13, %v589_v13  ;;  %v305_v21 = vsub.s32 %v302_v19, %v304_v16  ;;  %v720_v22 = vld [vmem:[%s1047_s25 + $0x30] sm:$0xff]   ;;  %v721_v24 = vld [vmem:[%s1047_s25 + $0x78] sm:$0xff]  }
  0x5f   : > { %617 = vmatpush3.bf16.msra.mxu0 %v710_v4  ;;  %v722_v25 = vld [vmem:[%s1047_s25 + $0x38] sm:$0xff]  }
  0x60   : > { %618 = vmatprep.subr.bf16.mxu0 %v711_v5  ;;  %v313_v23 = vrot.slane %v299_v18, %v305_v21  ;;  %v306_v26 = vrot.slane %v589_v13, %v305_v21  ;;  %v257_v28 = vld [vmem:[#allocation2] sm:$0x3] }
  0x61   : > { %v607_v35 = vld [vmem:[%s1123_s2] ss:$0 sm:$0xff] (!%p606_p13) }
  0x62   : > { %444 = vmatprep.mubr.bf16.mxu0 %v313_v23 }
  0x63   : > { %619 = vmatpush3.bf16.msra.mxu0 %v712_v6 }
  0x64   : > { %620 = vmatprep.subr.bf16.mxu0 %v713_v7 }
  0x67   : > { %621 = vmatpush3.bf16.msra.mxu0 %v714_v8 }
  0x68   : > { %622 = vmatprep.subr.bf16.mxu0 %v715_v9 }
  0x6b   : > { %623 = vmatpush3.bf16.msra.mxu0 %v716_v11 }
  0x6c   : > { %624 = vmatprep.subr.bf16.mxu0 %v717_v12 }
  0x6f   : > { %625 = vmatpush3.bf16.msra.mxu0 %v718_v17 }
  0x70   : > { %626 = vmatprep.subr.bf16.mxu0 %v719_v20 }
  0x73   : > { %627 = vmatpush3.bf16.msra.mxu0 %v720_v22 }
  0x74   : > { %628 = vmatprep.subr.bf16.mxu0 %v721_v24 }
  0x77   : > { %629 = vmatpush3.bf16.msra.mxu0 %v722_v25 }
  0x7a   : > { %445 = vmatmul.mubr.bf16.vlgmr.msra.gmra.mrb[0].mxu0 %v306_v26 }
 0x14d   : > { %v630_v27 = vpop.f32.mrb[0].mxu0  ;;  %457 = sbr.rel (%p606_p13) target bundleno = 350 (0x15e), region = 48 }
 0x14e   : > { %v631_v29 = vpop.f32.mrb[1].mxu0 }
 0x14f   : > { %v632_v30 = vadd.f32 %v631_v29, %v630_v27  ;;  %v633_v31 = vpop.f32.mrb[2].mxu0 }
 0x150   : > { %v634_v32 = vpop.f32.mrb[3].mxu0 }
 0x151   : > { %v452_v33 = vadd.f32 %v632_v30, %v257_v28 }
 0x153   : > { %453 = vst [vmem:[#allocation2] sm:$0x3] %v452_v33 }
 0x15a   : > { %v458_v34 = vld [vmem:[#allocation2] sm:$0x3] }
 0x15b   : > { %v466_v36 = vadd.f32 %v607_v35, %v458_v34 }
 0x15d   : > { %467 = vst [vmem:[#allocation8] sm:$0x3] %v466_v36 }
 0x15e PF: > { %p1077_p6 = scmp.eq.s32.totalorder %s575_s18, 3  ;;  %s875_s12 = smov [#allocation8]  }
 0x15f   : > { %s477_s30 = sshll.u32 %s875_s12, 4  ;;  %s478_s30 = int_to_ptr.vmem [resolvable:$true] %s477_s30 }
 0x160   : > { %s783_s15 = scalar_lea.vmem %s478_s30, 32  ;;  %p790_p1 = scmp.lt.s32.totalorder %s478_s30, %s478_s30 }
 0x161   : > { %p784_p8 = scmp.ne.s32.totalorder %s478_s30, %s783_s15  ;;  %p791_p5 = scmp.lt.s32.totalorder %s783_s15, %s783_s15 }
 0x163   : > { %p785_p3 = pnand %p784_p8, %p1077_p6  ;;  %p792_p10 = por %p791_p5, %p790_p1 }
 0x165   : > { %p786_p4 = pneg %p785_p3 }
 0x167   : > { %p793_p11 = pnand %p792_p10, %p786_p4 }
 0x169   : > { %796 = shalt.err (!%p793_p11)
}
 0x16a   : > { %s797_s18 = scalar_lea.hbm %s1124_s3, 32 }
 0x16b   : > { %p798_p12 = scmp.ne.s32.totalorder %s1124_s3, %s797_s18  ;;  %p803_p7 = scmp.lt.u32.totalorder %s797_s18, %s1124_s3 }
 0x16d   : > { %p799_p0 = pnand %p798_p12, %p1077_p6 }
 0x16f   : > { %p800_p2 = pneg %p799_p0 }
 0x171   : > { %p805_p9 = pnand %p803_p7, %p800_p2 }
 0x173   : > { %808 = shalt.err (!%p805_p9)
}
 0x174   : > { %641 = dma.vmem_to_hbm [thread:$0]  (%p1077_p6), %s478_s30, 32, %s1124_s3, [#allocation5]  }
 0x175   : > { %842 = dma.done.wait (%p1077_p6), [#allocation5], 32  }
 0x176   : > { %844 = vsyncadd (%p1077_p6), [#allocation5], 4294967264 }
 0x177 PF: > { %s20_s17 = sadd.s32 1, %s867_s17   ;;  %s1134_s12 = smov %s851_s13 }
 0x178   : > { %p17_p13 = scmp.ge.s32.totalorder %s20_s17, 6   ;;  %s1135_s13 = smov %s855_s14 }
 0x179   : > { %s1136_s14 = smov %s947_s24  ;;  %s1137_s15 = smov %s863_s16 }
 0x17a   : > { %s1138_s16 = smov %s1140_s19  ;;  %19 = sbr.rel (!%p17_p13) target bundleno = 7 (0x7), region = 94 }
 0x181   :  { %490 = vsyncpa [#allocation4], 1 }
 0x182   :  { %492 = vsyncpa [#allocation4 + $0x1], 1 }
 0x183   :  { %493 = vsyncpa [#allocation7], 1 }
 0x184   :  { %495 = vsyncpa [#allocation7 + $0x1], 1 }
 0x185   :  { %496 = vsyncpa [#allocation5], 1 }
 0x186   :  { %498 = vsyncpa [#allocation5 + $0x1], 1 }

</bundles_post_ra>
